<compile_context>
chip_gen: v7x
topology: tpu7x:2x2x1
jax: 0.10.0
libtpu: 0.0.40
codegen_flags: <defaults>
</compile_context>

<pallas_src>
import numpy as np

import jax
import jax.numpy as jnp
from jax.experimental import pallas as pl
from jax.experimental.pallas import tpu as pltpu

# ---- SRNN hyper-params (small, consistent with the module) ----
SEQ_LEN = 2            # seq_len
NENV = 4               # nenv
MAX_HUMAN = 8          # max_human_num
EMBED = 32             # config.SRNN.human_embedding_size
ATTN_SIZE = 16         # config.SRNN.hr_attention_size
NUM_HEADS = 2          # config.SRNN.hr_attn_head_num (>1 -> final_attn_linear path)

N = SEQ_LEN * NENV
NEG_INF = -1000000000.0
MAX_TILE_N = 128       # rows per grid step if N ever grows beyond one block


def edge_attention_kernel(esl_ref,                 # (Tn, 1) int32
                          ht_ref,                  # (Tn, E)
                          hs_ref,                  # (Tn*H, E)
                          wt_ref, bt_ref,          # (E, heads*A), (1, heads*A)
                          ws_ref, bs_ref,          # (E, heads*A), (1, heads*A)
                          wf_ref, bf_ref,          # (heads*E, E), (1, E)
                          out_ref,                 # (Tn, E)
                          attn_ref):               # (Tn, heads*H)
    tn, e = ht_ref.shape
    h = hs_ref.shape[0] // tn
    heads = attn_ref.shape[-1] // h
    a = wt_ref.shape[-1] // heads
    temperature = float(h) / np.sqrt(float(a))     # num_edges / sqrt(attention_size)

    ht = ht_ref[...]                               # (Tn, E)
    hs = hs_ref[...]                               # (Tn*H, E)

    # Batched embeddings for ALL heads at once (2 MXU matmuls total).
    t_emb = jnp.dot(ht, wt_ref[...], preferred_element_type=jnp.float32) + bt_ref[...]
    s_emb = jnp.dot(hs, ws_ref[...], preferred_element_type=jnp.float32) + bs_ref[...]

    hs3 = hs.reshape(tn, h, e)                     # (Tn, H, E)
    s_emb3 = s_emb.reshape(tn, h, heads * a)       # (Tn, H, heads*A)

    # Valid-human mask, built once (hoisted out of the head loop).
    col = jax.lax.broadcasted_iota(jnp.int32, (tn, h), 1)
    mask = col < esl_ref[...]                      # (Tn, H) bool

    attn_parts = []
    weighted_parts = []
    for i in range(heads):                         # static unroll over heads
        t_i = t_emb[:, i * a:(i + 1) * a]          # (Tn, A)
        s_i = s_emb3[:, :, i * a:(i + 1) * a]      # (Tn, H, A)

        # logits on the VPU (+ XLU lane reduce); no tiny MXU round-trips.
        logits = jnp.sum(s_i * t_i[:, None, :], axis=-1) * temperature    # (Tn, H)
        logits = jnp.where(mask, logits, NEG_INF)

        # masked softmax over humans
        m = jnp.max(logits, axis=-1, keepdims=True)
        p = jnp.exp(logits - m)
        denom = jnp.sum(p, axis=-1, keepdims=True)
        inv = pl.reciprocal(denom, approx=True)            # EUP slot
        inv = inv * (2.0 - denom * inv)                    # 1 Newton step -> ~f32 exact
        attn = p * inv                                     # (Tn, H)
        attn_parts.append(attn)

        # weighted value: sum_h attn[n,h] * hs[n,h,:]  (VPU mult + sublane reduce)
        weighted_parts.append(jnp.sum(attn[:, :, None] * hs3, axis=1))    # (Tn, E)

    # final_attn_linear(cat(weighted_heads)) as one MXU matmul.
    wcat = jnp.concatenate(weighted_parts, axis=-1)                        # (Tn, heads*E)
    out = jnp.dot(wcat, wf_ref[...], preferred_element_type=jnp.float32) + bf_ref[...]

    out_ref[...] = out.astype(out_ref.dtype)
    attn_ref[...] = jnp.concatenate(attn_parts, axis=-1).astype(attn_ref.dtype)


@jax.jit
def edge_attention_pallas(h_temporal, h_spatials, each_seq_len, params):
    seq_len, nenv, h, e = h_spatials.shape
    n = seq_len * nenv
    heads, _, a = params["Wt"].shape

    ht_flat = h_temporal.reshape(n, e)
    hs_flat = h_spatials.reshape(n * h, e)
    esl2d = each_seq_len.reshape(n, 1).astype(jnp.int32)

    # Pack per-head weights into head-concatenated, lane-dense matrices.
    wt_cat = jnp.concatenate([params["Wt"][i] for i in range(heads)], axis=-1)  # (E, heads*A)
    ws_cat = jnp.concatenate([params["Ws"][i] for i in range(heads)], axis=-1)
    bt_cat = jnp.concatenate([params["bt"][i] for i in range(heads)], axis=-1)  # (1, heads*A)
    bs_cat = jnp.concatenate([params["bs"][i] for i in range(heads)], axis=-1)
    wf_cat = params["Wf"].reshape(heads * e, e)                                 # (heads*E, E)
    bf = params["bf"]                                                           # (1, E)

    # One grid step for small N; chunk into 128-row blocks only if N grows.
    tile_n = n if n <= MAX_TILE_N else MAX_TILE_N
    pad = (-n) % tile_n
    if pad:
        ht_flat = jnp.pad(ht_flat, ((0, pad), (0, 0)))
        hs_flat = jnp.pad(hs_flat, ((0, pad * h), (0, 0)))
        esl2d = jnp.pad(esl2d, ((0, pad), (0, 0)))
    n_pad = n + pad
    grid = (n_pad // tile_n,)

    flops = (2 * n * e * heads * a             # temporal embeds
             + 2 * n * h * e * heads * a       # spatial embeds
             + 2 * n * heads * h * a           # logits
             + 2 * n * heads * h * e           # weighted sums
             + 2 * n * heads * e * e)          # final linear
    bytes_accessed = 4 * (ht_flat.size + hs_flat.size + esl2d.size
                          + wt_cat.size + ws_cat.size + bt_cat.size + bs_cat.size
                          + wf_cat.size + bf.size + n_pad * e + n_pad * heads * h)
    cost = pl.CostEstimate(flops=flops, transcendentals=n * heads * h,
                           bytes_accessed=bytes_accessed)

    out, attn = pl.pallas_call(
        edge_attention_kernel,
        out_shape=(
            jax.ShapeDtypeStruct((n_pad, e), jnp.float32),
            jax.ShapeDtypeStruct((n_pad, heads * h), jnp.float32),
        ),
        grid=grid,
        in_specs=[
            pl.BlockSpec((tile_n, 1), lambda i: (i, 0)),
            pl.BlockSpec((tile_n, e), lambda i: (i, 0)),
            pl.BlockSpec((tile_n * h, e), lambda i: (i, 0)),
            pl.BlockSpec((e, heads * a), lambda i: (0, 0)),
            pl.BlockSpec((1, heads * a), lambda i: (0, 0)),
            pl.BlockSpec((e, heads * a), lambda i: (0, 0)),
            pl.BlockSpec((1, heads * a), lambda i: (0, 0)),
            pl.BlockSpec((heads * e, e), lambda i: (0, 0)),
            pl.BlockSpec((1, e), lambda i: (0, 0)),
        ],
        out_specs=(
            pl.BlockSpec((tile_n, e), lambda i: (i, 0)),
            pl.BlockSpec((tile_n, heads * h), lambda i: (i, 0)),
        ),
        compiler_params=pltpu.CompilerParams(dimension_semantics=("parallel",)),
        cost_estimate=cost,
    )(esl2d, ht_flat, hs_flat, wt_cat, bt_cat, ws_cat, bs_cat, wf_cat, bf)

    out = out[:n]
    attn = attn[:n]
    weighted_value = out.reshape(seq_len, nenv, 1, e)
    attn_list = tuple(attn[:, i * h:(i + 1) * h, None] for i in range(heads))  # each (N, H, 1)
    return weighted_value, attn_list


def edge_attention_ref(h_temporal, h_spatials, each_seq_len, params):
    """Pure-JAX reference mirroring the PyTorch EdgeAttention_M.forward."""
    seq_len, nenv, H, E = h_spatials.shape
    n = seq_len * nenv
    ht = h_temporal.reshape(n, 1, E)
    hs = h_spatials.reshape(n, H, E)
    temperature = float(H) / np.sqrt(float(ATTN_SIZE))

    weighted_list, attn_list = [], []
    for i in range(NUM_HEADS):
        t_emb = ht @ params["Wt"][i] + params["bt"][i]          # (N,1,A)
        s_emb = hs @ params["Ws"][i] + params["bs"][i]          # (N,H,A)
        logits = jnp.sum(t_emb * s_emb, axis=-1) * temperature  # (N,H)
        mask = jnp.arange(H)[None, :] < each_seq_len[:, None]
        logits = jnp.where(mask, logits, NEG_INF)
        attn = jax.nn.softmax(logits, axis=-1)
        weighted_list.append(jnp.einsum("nh,nhe->ne", attn, hs))
        attn_list.append(attn[:, :, None])

    wcat = jnp.concatenate(weighted_list, axis=-1)              # (N, heads*E)
    wf_full = params["Wf"].reshape(NUM_HEADS * EMBED, EMBED)
    out = wcat @ wf_full + params["bf"][0]
    return out.reshape(seq_len, nenv, 1, EMBED), tuple(attn_list)


def init_params(key):
    ks = jax.random.split(key, 6)
    scale = 0.1
    return {
        "Wt": scale * jax.random.normal(ks[0], (NUM_HEADS, EMBED, ATTN_SIZE), jnp.float32),
        "bt": scale * jax.random.normal(ks[1], (NUM_HEADS, 1, ATTN_SIZE), jnp.float32),
        "Ws": scale * jax.random.normal(ks[2], (NUM_HEADS, EMBED, ATTN_SIZE), jnp.float32),
        "bs": scale * jax.random.normal(ks[3], (NUM_HEADS, 1, ATTN_SIZE), jnp.float32),
        "Wf": scale * jax.random.normal(ks[4], (NUM_HEADS, EMBED, EMBED), jnp.float32),
        "bf": scale * jax.random.normal(ks[5], (1, EMBED), jnp.float32),
    }


if __name__ == "__main__":
    key = jax.random.PRNGKey(0)
    k_p, k_t, k_s, k_l = jax.random.split(key, 4)

    params = init_params(k_p)
    h_temporal = jax.random.normal(k_t, (SEQ_LEN, NENV, 1, EMBED), jnp.float32)
    h_spatials = jax.random.normal(k_s, (SEQ_LEN, NENV, MAX_HUMAN, EMBED), jnp.float32)
    each_seq_len = jax.random.randint(k_l, (N,), 1, MAX_HUMAN + 1).astype(jnp.int32)

    wv, attn_list = edge_attention_pallas(h_temporal, h_spatials, each_seq_len, params)
    jax.block_until_ready(wv)
    jax.block_until_ready(attn_list)

    wv_ref, attn_ref_list = edge_attention_ref(h_temporal, h_spatials, each_seq_len, params)
    # tolerance slightly relaxed vs pure-f32 because the softmax denominator uses
    # the EUP approx reciprocal (+ one Newton step)
    np.testing.assert_allclose(np.asarray(wv), np.asarray(wv_ref), rtol=1e-4, atol=1e-4)
    for a_k, a_r in zip(attn_list, attn_ref_list):
        np.testing.assert_allclose(np.asarray(a_k), np.asarray(a_r), rtol=1e-4, atol=1e-4)

    print("KERNEL_OK")
</pallas_src>

<mosaic_0001>
module attributes {stable_mosaic.version = 11 : i64} {
  func.func @edge_attention_kernel(%arg0: i32, %arg1: memref<8x1xi32, #tpu.memory_space<vmem>>, %arg2: memref<8x32xf32, #tpu.memory_space<vmem>>, %arg3: memref<64x32xf32, #tpu.memory_space<vmem>>, %arg4: memref<32x32xf32, #tpu.memory_space<vmem>>, %arg5: memref<1x32xf32, #tpu.memory_space<vmem>>, %arg6: memref<32x32xf32, #tpu.memory_space<vmem>>, %arg7: memref<1x32xf32, #tpu.memory_space<vmem>>, %arg8: memref<64x32xf32, #tpu.memory_space<vmem>>, %arg9: memref<1x32xf32, #tpu.memory_space<vmem>>, %arg10: memref<8x32xf32, #tpu.memory_space<vmem>>, %arg11: memref<8x16xf32, #tpu.memory_space<vmem>>) attributes {dimension_semantics = [#tpu.dimension_semantics<parallel>], iteration_bounds = array<i64: 1>, scalar_prefetch = 0 : i64, scratch_operands = 0 : i64, tpu.core_type = #tpu.core_type<tc>, window_params = [{transform_indices = @transform_0, window_bounds = array<i64: 8, 1>}, {transform_indices = @transform_1, window_bounds = array<i64: 8, 32>}, {transform_indices = @transform_2, window_bounds = array<i64: 64, 32>}, {pipeline_mode = #tpu.pipeline_mode<synchronous>, transform_indices = @transform_3, window_bounds = array<i64: 32, 32>}, {pipeline_mode = #tpu.pipeline_mode<synchronous>, transform_indices = @transform_4, window_bounds = array<i64: 1, 32>}, {pipeline_mode = #tpu.pipeline_mode<synchronous>, transform_indices = @transform_5, window_bounds = array<i64: 32, 32>}, {pipeline_mode = #tpu.pipeline_mode<synchronous>, transform_indices = @transform_6, window_bounds = array<i64: 1, 32>}, {pipeline_mode = #tpu.pipeline_mode<synchronous>, transform_indices = @transform_7, window_bounds = array<i64: 64, 32>}, {pipeline_mode = #tpu.pipeline_mode<synchronous>, transform_indices = @transform_8, window_bounds = array<i64: 1, 32>}, {transform_indices = @transform_9, window_bounds = array<i64: 8, 32>}, {transform_indices = @transform_10, window_bounds = array<i64: 8, 16>}]} {
    %c0 = arith.constant 0 : index
    %c0_0 = arith.constant 0 : index
    %0 = vector.load %arg2[%c0, %c0_0] : memref<8x32xf32, #tpu.memory_space<vmem>>, vector<8x32xf32>
    %c0_1 = arith.constant 0 : index
    %c0_2 = arith.constant 0 : index
    %1 = vector.load %arg3[%c0_1, %c0_2] : memref<64x32xf32, #tpu.memory_space<vmem>>, vector<64x32xf32>
    %c0_3 = arith.constant 0 : index
    %c0_4 = arith.constant 0 : index
    %2 = vector.load %arg4[%c0_3, %c0_4] : memref<32x32xf32, #tpu.memory_space<vmem>>, vector<32x32xf32>
    %cst = arith.constant dense<0.000000e+00> : vector<8x32xf32>
    %3 = tpu.matmul %0, %2, %cst {dimension_numbers = #tpu.dot_dimension_numbers<[1], [0], [0], [1], [0, 0, 1, 1], [], []>} : vector<8x32xf32>, vector<32x32xf32>, vector<8x32xf32> -> vector<8x32xf32>
    %c0_5 = arith.constant 0 : index
    %c0_6 = arith.constant 0 : index
    %4 = vector.load %arg5[%c0_5, %c0_6] : memref<1x32xf32, #tpu.memory_space<vmem>>, vector<1x32xf32>
    %5 = vector.broadcast %4 : vector<1x32xf32> to vector<8x32xf32>
    %6 = arith.addf %3, %5 : vector<8x32xf32>
    %c0_7 = arith.constant 0 : index
    %c0_8 = arith.constant 0 : index
    %7 = vector.load %arg6[%c0_7, %c0_8] : memref<32x32xf32, #tpu.memory_space<vmem>>, vector<32x32xf32>
    %cst_9 = arith.constant dense<0.000000e+00> : vector<64x32xf32>
    %8 = tpu.matmul %1, %7, %cst_9 {dimension_numbers = #tpu.dot_dimension_numbers<[1], [0], [0], [1], [0, 0, 1, 1], [], []>} : vector<64x32xf32>, vector<32x32xf32>, vector<64x32xf32> -> vector<64x32xf32>
    %c0_10 = arith.constant 0 : index
    %c0_11 = arith.constant 0 : index
    %9 = vector.load %arg7[%c0_10, %c0_11] : memref<1x32xf32, #tpu.memory_space<vmem>>, vector<1x32xf32>
    %10 = vector.broadcast %9 : vector<1x32xf32> to vector<64x32xf32>
    %11 = arith.addf %8, %10 : vector<64x32xf32>
    %12 = vector.shape_cast %1 : vector<64x32xf32> to vector<8x8x32xf32>
    %13 = vector.shape_cast %11 : vector<64x32xf32> to vector<8x8x32xf32>
    %14 = tpu.iota {dimensions = array<i32: 1>} : vector<8x8xi32>
    %c0_12 = arith.constant 0 : index
    %c0_13 = arith.constant 0 : index
    %15 = vector.load %arg1[%c0_12, %c0_13] : memref<8x1xi32, #tpu.memory_space<vmem>>, vector<8x1xi32>
    %16 = vector.broadcast %15 : vector<8x1xi32> to vector<8x8xi32>
    %17 = arith.cmpi slt, %14, %16 : vector<8x8xi32>
    %18 = vector.extract_strided_slice %6 {offsets = [0, 0], sizes = [8, 16], strides = [1, 1]} : vector<8x32xf32> to vector<8x16xf32>
    %19 = vector.extract_strided_slice %13 {offsets = [0, 0, 0], sizes = [8, 8, 16], strides = [1, 1, 1]} : vector<8x8x32xf32> to vector<8x8x16xf32>
    %20 = vector.shape_cast %18 : vector<8x16xf32> to vector<8x1x16xf32>
    %21 = vector.broadcast %20 : vector<8x1x16xf32> to vector<8x8x16xf32>
    %22 = arith.mulf %19, %21 : vector<8x8x16xf32>
    %cst_14 = arith.constant dense<0.000000e+00> : vector<8x8xf32>
    %23 = vector.multi_reduction <add>, %22, %cst_14 [2] : vector<8x8x16xf32> to vector<8x8xf32>
    %cst_15 = arith.constant 2.000000e+00 : f32
    %24 = vector.broadcast %cst_15 : f32 to vector<8x8xf32>
    %25 = arith.mulf %23, %24 : vector<8x8xf32>
    %cst_16 = arith.constant -1.000000e+09 : f32
    %26 = vector.broadcast %cst_16 : f32 to vector<8x8xf32>
    %27 = arith.select %17, %25, %26 : vector<8x8xi1>, vector<8x8xf32>
    %cst_17 = arith.constant dense<0xFF800000> : vector<8xf32>
    %28 = vector.multi_reduction <maximumf>, %27, %cst_17 [1] : vector<8x8xf32> to vector<8xf32>
    %29 = vector.shape_cast %28 : vector<8xf32> to vector<8x1xf32>
    %30 = vector.broadcast %29 : vector<8x1xf32> to vector<8x8xf32>
    %31 = arith.subf %27, %30 : vector<8x8xf32>
    %32 = math.exp %31 : vector<8x8xf32>
    %cst_18 = arith.constant dense<0.000000e+00> : vector<8xf32>
    %33 = vector.multi_reduction <add>, %32, %cst_18 [1] : vector<8x8xf32> to vector<8xf32>
    %34 = vector.shape_cast %33 : vector<8xf32> to vector<8x1xf32>
    %35 = tpu.reciprocal %34 {approx = true} : vector<8x1xf32> -> vector<8x1xf32>
    %36 = arith.mulf %34, %35 : vector<8x1xf32>
    %cst_19 = arith.constant 2.000000e+00 : f32
    %37 = vector.broadcast %cst_19 : f32 to vector<8x1xf32>
    %38 = arith.subf %37, %36 : vector<8x1xf32>
    %39 = arith.mulf %35, %38 : vector<8x1xf32>
    %40 = vector.broadcast %39 : vector<8x1xf32> to vector<8x8xf32>
    %41 = arith.mulf %32, %40 : vector<8x8xf32>
    %42 = vector.shape_cast %41 : vector<8x8xf32> to vector<8x8x1xf32>
    %43 = vector.broadcast %42 : vector<8x8x1xf32> to vector<8x8x32xf32>
    %44 = arith.mulf %43, %12 : vector<8x8x32xf32>
    %cst_20 = arith.constant dense<0.000000e+00> : vector<8x32xf32>
    %45 = vector.multi_reduction <add>, %44, %cst_20 [1] : vector<8x8x32xf32> to vector<8x32xf32>
    %46 = vector.extract_strided_slice %6 {offsets = [0, 16], sizes = [8, 16], strides = [1, 1]} : vector<8x32xf32> to vector<8x16xf32>
    %47 = vector.extract_strided_slice %13 {offsets = [0, 0, 16], sizes = [8, 8, 16], strides = [1, 1, 1]} : vector<8x8x32xf32> to vector<8x8x16xf32>
    %48 = vector.shape_cast %46 : vector<8x16xf32> to vector<8x1x16xf32>
    %49 = vector.broadcast %48 : vector<8x1x16xf32> to vector<8x8x16xf32>
    %50 = arith.mulf %47, %49 : vector<8x8x16xf32>
    %cst_21 = arith.constant dense<0.000000e+00> : vector<8x8xf32>
    %51 = vector.multi_reduction <add>, %50, %cst_21 [2] : vector<8x8x16xf32> to vector<8x8xf32>
    %cst_22 = arith.constant 2.000000e+00 : f32
    %52 = vector.broadcast %cst_22 : f32 to vector<8x8xf32>
    %53 = arith.mulf %51, %52 : vector<8x8xf32>
    %cst_23 = arith.constant -1.000000e+09 : f32
    %54 = vector.broadcast %cst_23 : f32 to vector<8x8xf32>
    %55 = arith.select %17, %53, %54 : vector<8x8xi1>, vector<8x8xf32>
    %cst_24 = arith.constant dense<0xFF800000> : vector<8xf32>
    %56 = vector.multi_reduction <maximumf>, %55, %cst_24 [1] : vector<8x8xf32> to vector<8xf32>
    %57 = vector.shape_cast %56 : vector<8xf32> to vector<8x1xf32>
    %58 = vector.broadcast %57 : vector<8x1xf32> to vector<8x8xf32>
    %59 = arith.subf %55, %58 : vector<8x8xf32>
    %60 = math.exp %59 : vector<8x8xf32>
    %cst_25 = arith.constant dense<0.000000e+00> : vector<8xf32>
    %61 = vector.multi_reduction <add>, %60, %cst_25 [1] : vector<8x8xf32> to vector<8xf32>
    %62 = vector.shape_cast %61 : vector<8xf32> to vector<8x1xf32>
    %63 = tpu.reciprocal %62 {approx = true} : vector<8x1xf32> -> vector<8x1xf32>
    %64 = arith.mulf %62, %63 : vector<8x1xf32>
    %cst_26 = arith.constant 2.000000e+00 : f32
    %65 = vector.broadcast %cst_26 : f32 to vector<8x1xf32>
    %66 = arith.subf %65, %64 : vector<8x1xf32>
    %67 = arith.mulf %63, %66 : vector<8x1xf32>
    %68 = vector.broadcast %67 : vector<8x1xf32> to vector<8x8xf32>
    %69 = arith.mulf %60, %68 : vector<8x8xf32>
    %70 = vector.shape_cast %69 : vector<8x8xf32> to vector<8x8x1xf32>
    %71 = vector.broadcast %70 : vector<8x8x1xf32> to vector<8x8x32xf32>
    %72 = arith.mulf %71, %12 : vector<8x8x32xf32>
    %cst_27 = arith.constant dense<0.000000e+00> : vector<8x32xf32>
    %73 = vector.multi_reduction <add>, %72, %cst_27 [1] : vector<8x8x32xf32> to vector<8x32xf32>
    %74 = tpu.concatenate %45, %73 in 1 : vector<8x32xf32>, vector<8x32xf32> -> vector<8x64xf32>
    %c0_28 = arith.constant 0 : index
    %c0_29 = arith.constant 0 : index
    %75 = vector.load %arg8[%c0_28, %c0_29] : memref<64x32xf32, #tpu.memory_space<vmem>>, vector<64x32xf32>
    %cst_30 = arith.constant dense<0.000000e+00> : vector<8x32xf32>
    %76 = tpu.matmul %74, %75, %cst_30 {dimension_numbers = #tpu.dot_dimension_numbers<[1], [0], [0], [1], [0, 0, 1, 1], [], []>} : vector<8x64xf32>, vector<64x32xf32>, vector<8x32xf32> -> vector<8x32xf32>
    %c0_31 = arith.constant 0 : index
    %c0_32 = arith.constant 0 : index
    %77 = vector.load %arg9[%c0_31, %c0_32] : memref<1x32xf32, #tpu.memory_space<vmem>>, vector<1x32xf32>
    %78 = vector.broadcast %77 : vector<1x32xf32> to vector<8x32xf32>
    %79 = arith.addf %76, %78 : vector<8x32xf32>
    %c0_33 = arith.constant 0 : index
    %c0_34 = arith.constant 0 : index
    %80 = vector.load %arg10[%c0_33, %c0_34] : memref<8x32xf32, #tpu.memory_space<vmem>>, vector<8x32xf32>
    tpu.vector_store %arg10[%c0_33, %c0_34], %79 {strides = array<i32>} : memref<8x32xf32, #tpu.memory_space<vmem>>, vector<8x32xf32>,
    %81 = tpu.concatenate %41, %69 in 1 : vector<8x8xf32>, vector<8x8xf32> -> vector<8x16xf32>
    %c0_35 = arith.constant 0 : index
    %c0_36 = arith.constant 0 : index
    %82 = vector.load %arg11[%c0_35, %c0_36] : memref<8x16xf32, #tpu.memory_space<vmem>>, vector<8x16xf32>
    tpu.vector_store %arg11[%c0_35, %c0_36], %81 {strides = array<i32>} : memref<8x16xf32, #tpu.memory_space<vmem>>, vector<8x16xf32>,
    return
  }
  func.func @transform_0(%arg0: i32) -> (i32, i32) {
    %c0_i32 = arith.constant 0 : i32
    %c0_i32_0 = arith.constant 0 : i32
    return %arg0, %c0_i32 : i32, i32
  }
  func.func @transform_1(%arg0: i32) -> (i32, i32) {
    %c0_i32 = arith.constant 0 : i32
    %c0_i32_0 = arith.constant 0 : i32
    return %arg0, %c0_i32 : i32, i32
  }
  func.func @transform_2(%arg0: i32) -> (i32, i32) {
    %c0_i32 = arith.constant 0 : i32
    %c0_i32_0 = arith.constant 0 : i32
    return %arg0, %c0_i32 : i32, i32
  }
  func.func @transform_3(%arg0: i32) -> (i32, i32) {
    %c0_i32 = arith.constant 0 : i32
    %c0_i32_0 = arith.constant 0 : i32
    %c0_i32_1 = arith.constant 0 : i32
    return %c0_i32, %c0_i32_0 : i32, i32
  }
  func.func @transform_4(%arg0: i32) -> (i32, i32) {
    %c0_i32 = arith.constant 0 : i32
    %c0_i32_0 = arith.constant 0 : i32
    %c0_i32_1 = arith.constant 0 : i32
    return %c0_i32, %c0_i32_0 : i32, i32
  }
  func.func @transform_5(%arg0: i32) -> (i32, i32) {
    %c0_i32 = arith.constant 0 : i32
    %c0_i32_0 = arith.constant 0 : i32
    %c0_i32_1 = arith.constant 0 : i32
    return %c0_i32, %c0_i32_0 : i32, i32
  }
  func.func @transform_6(%arg0: i32) -> (i32, i32) {
    %c0_i32 = arith.constant 0 : i32
    %c0_i32_0 = arith.constant 0 : i32
    %c0_i32_1 = arith.constant 0 : i32
    return %c0_i32, %c0_i32_0 : i32, i32
  }
  func.func @transform_7(%arg0: i32) -> (i32, i32) {
    %c0_i32 = arith.constant 0 : i32
    %c0_i32_0 = arith.constant 0 : i32
    %c0_i32_1 = arith.constant 0 : i32
    return %c0_i32, %c0_i32_0 : i32, i32
  }
  func.func @transform_8(%arg0: i32) -> (i32, i32) {
    %c0_i32 = arith.constant 0 : i32
    %c0_i32_0 = arith.constant 0 : i32
    %c0_i32_1 = arith.constant 0 : i32
    return %c0_i32, %c0_i32_0 : i32, i32
  }
  func.func @transform_9(%arg0: i32) -> (i32, i32) {
    %c0_i32 = arith.constant 0 : i32
    %c0_i32_0 = arith.constant 0 : i32
    return %arg0, %c0_i32 : i32, i32
  }
  func.func @transform_10(%arg0: i32) -> (i32, i32) {
    %c0_i32 = arith.constant 0 : i32
    %c0_i32_0 = arith.constant 0 : i32
    return %arg0, %c0_i32 : i32, i32
  }
}

</mosaic_0001>

<bundles_post_ra>
// kernel: edge_attention_pallas.1
= control target key start
LH: loop header
LB: loop body
LE: loop exit
PB: predicated region body
PF: predicated region fallthrough
CT: control target
= control target key end

     0   :  { %v1152_v3 = vmov 0.0|0.0   ;;  %vm1153_vm0 = vmmov 0   ;;  %v1154_v8 = vmov 0.0   ;;  %vm55_vm1 = vcmask 261120   ;;  %s1506_s0 = inlined_call_operand.vmem [shape: s32[8,1], index: 0, kind: input, shape index: {}]   ;;  %s1507_s1 = inlined_call_operand.vmem [shape: f32[8,32], index: 1, kind: input, shape index: {}]   ;;  %s1508_s2 = inlined_call_operand.vmem [shape: f32[64,32], index: 2, kind: input, shape index: {}]   ;;  %s1509_s3 = inlined_call_operand.vmem [shape: f32[32,32], index: 3, kind: input, shape index: {}]   ;;  %s1510_s4 = inlined_call_operand.vmem [shape: f32[1,32], index: 4, kind: input, shape index: {}]   ;;  %s1511_s5 = inlined_call_operand.vmem [shape: f32[32,32], index: 5, kind: input, shape index: {}]   ;;  %s1512_s6 = inlined_call_operand.vmem [shape: f32[1,32], index: 6, kind: input, shape index: {}]   ;;  %s1513_s7 = inlined_call_operand.vmem [shape: f32[64,32], index: 7, kind: input, shape index: {}]   ;;  %s1514_s8 = inlined_call_operand.vmem [shape: f32[1,32], index: 8, kind: input, shape index: {}]   ;;  %s1515_s9 = inlined_call_operand.hbm [shape: f32[8,32], index: 9, kind: output, shape index: {0}]   ;;  %s1516_s10 = inlined_call_operand.vmem [shape: f32[8,16], index: 10, kind: output, shape index: {1}]  }
   0x1   :  { %v44_v0 = vld [vmem:[%s1509_s3] sm:$0xff]  ;;  %v45_v1 = vld [vmem:[%s1509_s3 + $0x8] sm:$0xff]  ;;  %1083 = vmatprep.subr.bf16.mxu0 %v1152_v3  ;;  %v46_v6 = vld [vmem:[%s1509_s3 + $0x10] sm:$0xff]  ;;  %1041 = vmatprep.mubr.msk.f32.mxu0 %vm1153_vm0, %v1154_v8 }
   0x2   :  { %v129_v2 = vld [vmem:[%s1511_s5] sm:$0xff]  ;;  %v1084_v4 = vpack.c.bf16 %v45_v1, %v44_v0  ;;  %v130_v5 = vld [vmem:[%s1511_s5 + $0x8] sm:$0xff]  ;;  %v47_v7 = vld [vmem:[%s1509_s3 + $0x18] sm:$0xff] }
   0x3   :  { %v1089_v9 = vpack.c.bf16 %v130_v5, %v129_v2  ;;  %v131_v10 = vld [vmem:[%s1511_s5 + $0x10] sm:$0xff]  ;;  %v132_v11 = vld [vmem:[%s1511_s5 + $0x18] sm:$0xff]  ;;  %v1087_v12 = vpack.c.bf16 %v47_v7, %v46_v6  ;;  %v1245_v14 = vld [vmem:[%s1508_s2] sm:$0xff] }
   0x4   :  { %1085 = vmatpush3.bf16.msra.mxu0 %v1084_v4  ;;  %v1093_v13 = vpack.c.bf16 %v132_v11, %v131_v10  ;;  %1052 = vmatprep.mubr.msk.f32.mxu1 %vm55_vm1, %v1245_v14 }
   0x5   :  { %1090 = vmatprep.subr.bf16.mxu1 %v1089_v9  ;;  %1086 = vmatprep.subr.bf16.mxu0 %v1152_v3 }
   0x6   :  { %1092 = vmatpush3.bf16.msra.mxu1 %v1089_v9 }
   0x7   :  { %1094 = vmatprep.subr.bf16.mxu1 %v1093_v13 }
   0x8   :  { %16 = vsyncpa [#allocation3], 0  ;;  %1088 = vmatpush3.bf16.msra.mxu0 %v1087_v12  ;;  %v35_v15 = vld [vmem:[%s1507_s1] sm:$0xff]  ;;  %v1257_v16 = vld [vmem:[%s1508_s2 + $0x8] sm:$0xff]  ;;  %v269_v23 = vlaneseq  ;;  %v1155_v24 = vmov 1966171168  }
   0x9   :  { %1097 = vmatprep.subr.bf16.mxu0 %v1152_v3  ;;  %v1263_v17 = vld [vmem:[%s1508_s2 + $0x10] sm:$0xff]  ;;  %v1273_v18 = vld [vmem:[%s1508_s2 + $0x18] sm:$0xff]  ;;  %v1278_v19 = vld [vmem:[%s1508_s2 + $0x20] sm:$0xff]  ;;  %v279_v25 = vunpack.c.l.s4 %v1155_v24  ;;  %vm374_vm2 = vcmask 130048   ;;  %vm447_vm3 = vcmask 1041409   ;;  %vm449_vm4 = vcmask 1042434  }
   0xa   :  { %1096 = vmatpush3.bf16.msra.mxu1 %v1093_v13  ;;  %v1287_v20 = vld [vmem:[%s1508_s2 + $0x28] sm:$0xff]  ;;  %v1292_v21 = vld [vmem:[%s1508_s2 + $0x30] sm:$0xff]  ;;  %v1301_v22 = vld [vmem:[%s1508_s2 + $0x38] sm:$0xff]  ;;  %v1306_v27 = vshrl.u32 %v269_v23, 7  ;;  %vm451_vm5 = vcmask 1043459   ;;  %vm453_vm6 = vcmask 1044484  }
   0xb   :  { %1042 = vmatmul.mubr.msk.f32.vlgmr.msra.gmra.mrb[0].mxu0 %vm55_vm1, %v35_v15  ;;  %v280_v26 = vunpack.c.0.s8 %v279_v25  ;;  %v994_v28 = vld [vmem:[%s1510_s4] ss:$0 sm:$0xff]  ;;  %s1156_s4 = smov 112   ;;  %vm455_vm7 = vcmask 1045509   ;;  %vm457_vm8 = vcmask 1046534   ;;  %vm459_vm9 = vcmask 1047559  }
   0xc   :  { %1080 = vmatprep.mubr.msk.f32.mxu0 %vm1153_vm0, %v1154_v8  ;;  %v996_v36 = vld [vmem:[%s1512_s6] ss:$0 sm:$0xff]  ;;  %v1316_v38 = vsub.s32 0, %v1306_v27  ;;  %vm463_vm11 = vcmask 64512   ;;  %s1158_s13 = smov 8   ;;  %vm895_vm12 = vcmask 523264  }
   0xd   :  { %1053 = vmatmul.mubr.msk.f32.vlgmr.msra.gmra.mrb[0].mxu1 %vm55_vm1, %v1257_v16  ;;  %v283_v29 = vsub.s32 %v280_v26, %v1306_v27  ;;  %v1157_v26 = vmov 0   ;;  %s1160_s24 = smov [#allocation2]  }
   0xe   :  { %1055 = vmatprep.mubr.msk.f32.mxu1 %vm55_vm1, %v1263_v17  ;;  %1118 = vset.pattern.permute.xlu1 %v1157_v26  ;;  %s982_s25 = sshll.u32 %s1160_s24, 4  ;;  %s983_s25 = int_to_ptr.vmem [resolvable:$true] %s982_s25 }
   0xf   :  { %1119 = vset.pattern.permute.xlu0 %v1157_v26  ;;  %s1128_s2 = scalar_lea.vmem %s983_s25, 128  ;;  %p1133_p1 = scmp.lt.s32.totalorder %s983_s25, %s983_s25 }
  0x10   :  { %p1129_p0 = scmp.ne.s32.totalorder %s983_s25, %s1128_s2  ;;  %p1134_p2 = scmp.lt.s32.totalorder %s1128_s2, %s1128_s2 }
  0x11   :  { %1056 = vmatmul.mubr.msk.f32.gmra.mrb[2].mxu1 %vm55_vm1, %v1273_v18 }
  0x12   :  { %1058 = vmatprep.mubr.msk.f32.mxu1 %vm55_vm1, %v1278_v19  ;;  %p1135_p3 = por %p1134_p2, %p1133_p1 }
  0x14   :  { %p1136_p4 = pnand %p1135_p3, %p1129_p0 }
  0x15   :  { %1059 = vmatmul.mubr.msk.f32.gmra.mrb[4].mxu1 %vm55_vm1, %v1287_v20 }
  0x16   :  { %1061 = vmatprep.mubr.msk.f32.mxu1 %vm55_vm1, %v1292_v21 }
  0x19   :  { %1062 = vmatmul.mubr.msk.f32.gmra.mrb[6].mxu1 %vm55_vm1, %v1301_v22 }
  0xde   :  { %v125_v30 = vpop.f32.mrb[0].mxu0 }
  0xdf   :  { %v126_v31 = vadd.f32 %v994_v28, %v125_v30  ;;  %v1043_v32 = vpop.f32.mrb[1].mxu0 }
  0xe0   :  { %v1054_v33 = vpop.f32.mrb[0].mxu1 }
  0xe1   :  { %v277_v34 = vcombine.high %v126_v31, %v126_v31  ;;  %v284_v35 = vrot.slane %v126_v31, %v283_v29  ;;  %v230_v37 = vpop.f32.mrb[1].mxu1  ;;  %v236_v48 = vadd.f32 %v1054_v33, %v996_v36 }
  0xe2   :  { %v231_v42 = vadd.f32 %v996_v36, %v230_v37 }
  0xe3   :  { %v291_v39 = vrot.slane %v277_v34, %v283_v29  ;;  %v292_v40 = vcombine.high %v284_v35, %v284_v35  ;;  %v300_v41 = vrot.slane %v284_v35, %v283_v29 }
  0xe4   :  { %v1057_v43 = vpop.f32.mrb[2].mxu1 }
  0xe5   :  { %v293_v44 = vcombine.high %v291_v39, %v291_v39  ;;  %v314_v45 = vrot.slane %v292_v40, %v283_v29  ;;  %v240_v46 = vpop.f32.mrb[3].mxu1  ;;  %v307_v47 = vrot.slane %v291_v39, %v283_v29  ;;  %v329_v50 = vrot.slane %v300_v41, %v1316_v38 }
  0xe6   :  { %v241_v49 = vadd.f32 %v996_v36, %v240_v46  ;;  %v322_v51 = vcombine.high %v300_v41, %v300_v41  ;;  %v246_v53 = vadd.f32 %v1057_v43, %v996_v36 }
  0xe7   :  { %v333_v52 = vrot.slane %v314_v45, %v1316_v38  ;;  %v324_v54 = vcombine.high %v314_v45, %v314_v45  ;;  %v321_v55 = vrot.slane %v293_v44, %v283_v29  ;;  %v345_v57 = vrot.slane %v307_v47, %v1316_v38 }
  0xe8   :  { %v1060_v56 = vpop.f32.mrb[4].mxu1  ;;  %v366_v58 = vmul.f32 %v329_v50, %v231_v42  ;;  %v337_v59 = vrot.slane %v322_v51, %v1316_v38  ;;  %v323_v5 = vcombine.high %v307_v47, %v307_v47  ;;  %v271_v47 = vld [vmem:[%s1506_s0] sm:$0xff] }
  0xe9   :  { %v367_v60 = vmul.f32 %v333_v52, %v236_v48  ;;  %v341_v61 = vrot.slane %v324_v54, %v1316_v38  ;;  %v256_v62 = vadd.f32 %v1060_v56, %v996_v36  ;;  %v349_v63 = vrot.slane %v321_v55, %v1316_v38  ;;  %v250_v0 = vpop.f32.mrb[5].mxu1 }
  0xea   :  { %v251_v1 = vadd.f32 %v996_v36, %v250_v0  ;;  %606 = vrot.lane.b32.xlu0 %v366_v58, %s1156_s4  ;;  %v325_v2 = vcombine.high %v321_v55, %v321_v55  ;;  %v368_v4 = vmul.f32 %v337_v59, %v241_v49  ;;  %v353_v15 = vrot.slane %v323_v5, %v1316_v38 }
  0xeb   :  { %v369_v6 = vmul.f32 %v341_v61, %v246_v53  ;;  %v371_v7 = vmul.f32 %v349_v63, %v256_v62  ;;  %v375_v45 = vsel %vm374_vm2, %v366_v58, 0.0  ;;  %v378_v46 = vsel %vm374_vm2, %v367_v60, 0.0 }
  0xec   :  { %v370_v8 = vmul.f32 %v345_v57, %v251_v1  ;;  %v1063_v9 = vpop.f32.mrb[6].mxu1  ;;  %v357_v10 = vrot.slane %v325_v2, %v1316_v38  ;;  %610 = vrot.lane.b32.xlu1 %v368_v4, %s1156_s4  ;;  %v381_v48 = vsel %vm374_vm2, %v368_v4, 0.0  ;;  %v1346_v54 = vand.u32 127, %v269_v23 }
  0xed   :  { %v266_v11 = vadd.f32 %v1063_v9, %v996_v36  ;;  %v260_v12 = vpop.f32.mrb[7].mxu1  ;;  %v384_v49 = vsel %vm374_vm2, %v369_v6, 0.0  ;;  %v390_v50 = vsel %vm374_vm2, %v371_v7, 0.0 }
  0xee   :  { %v261_v13 = vadd.f32 %v996_v36, %v260_v12  ;;  %608 = vrot.lane.b32.xlu0 %v367_v60, %s1156_s4  ;;  %v387_v53 = vsel %vm374_vm2, %v370_v8, 0.0  ;;  %v1350_v56 = vsub.s32 %v1346_v54, %v1306_v27 }
  0xef   :  { %v373_v24 = vmul.f32 %v357_v10, %v266_v11 }
  0xf0   :  { %v372_v25 = vmul.f32 %v353_v15, %v261_v13  ;;  %612 = vrot.lane.b32.xlu1 %v369_v6, %s1156_s4 }
  0xf1   :  { %v396_v52 = vsel %vm374_vm2, %v373_v24, 0.0 }
  0xf2   :  { %614 = vrot.lane.b32.xlu0 %v370_v8, %s1156_s4  ;;  %v393_v51 = vsel %vm374_vm2, %v372_v25, 0.0 }
  0xf4   :  { %616 = vrot.lane.b32.xlu1 %v371_v7, %s1156_s4 }
  0xf6   :  { %618 = vrot.lane.b32.xlu0 %v372_v25, %s1156_s4 }
  0xf8   :  { %620 = vrot.lane.b32.xlu1 %v373_v24, %s1156_s4 }
 0x15c   :  { %v607_v28 = vpop.permute.xlu0 %606 }
 0x15d   :  { %v630_v29 = vsel %vm374_vm2, %v607_v28, 0.0 }
 0x15e   :  { %v611_v30 = vpop.permute.xlu1 %610  ;;  %631 = vadd.xlane.f32.xlu0 %v630_v29 }
 0x15f   :  { %v636_v32 = vsel %vm374_vm2, %v611_v30, 0.0 }
 0x160   :  { %v609_v31 = vpop.permute.xlu0 %608 }
 0x161   :  { %v633_v33 = vsel %vm374_vm2, %v609_v31, 0.0 }
 0x162   :  { %v613_v34 = vpop.permute.xlu1 %612  ;;  %637 = vadd.xlane.f32.xlu0 %v636_v32  ;;  %634 = vadd.xlane.f32.xlu1 %v633_v33 }
 0x163   :  { %v639_v36 = vsel %vm374_vm2, %v613_v34, 0.0 }
 0x164   :  { %v615_v35 = vpop.permute.xlu0 %614 }
 0x165   :  { %v642_v37 = vsel %vm374_vm2, %v615_v35, 0.0 }
 0x166   :  { %640 = vadd.xlane.f32.xlu0 %v639_v36  ;;  %v617_v39 = vpop.permute.xlu1 %616  ;;  %643 = vadd.xlane.f32.xlu1 %v642_v37 }
 0x167   :  { %v645_v41 = vsel %vm374_vm2, %v617_v39, 0.0 }
 0x168   :  { %v619_v40 = vpop.permute.xlu0 %618 }
 0x169   :  { %v648_v42 = vsel %vm374_vm2, %v619_v40, 0.0 }
 0x16a   :  { %646 = vadd.xlane.f32.xlu0 %v645_v41  ;;  %649 = vadd.xlane.f32.xlu1 %v648_v42  ;;  %v621_v43 = vpop.permute.xlu1 %620 }
 0x16b   :  { %v651_v44 = vsel %vm374_vm2, %v621_v43, 0.0 }
 0x16e   :  { %652 = vadd.xlane.f32.xlu0 %v651_v44 }
 0x172   :  { %376 = vadd.xlane.f32.xlu0 %v375_v45 }
 0x176   :  { %379 = vadd.xlane.f32.xlu0 %v378_v46 }
 0x17a   :  { %382 = vadd.xlane.f32.xlu0 %v381_v48 }
 0x17b   :  { %273 = vperm.xlu1 %1118, %v271_v47  }
 0x17e   :  { %385 = vadd.xlane.f32.xlu0 %v384_v49 }
 0x182   :  { %391 = vadd.xlane.f32.xlu0 %v390_v50 }
 0x186   :  { %394 = vadd.xlane.f32.xlu0 %v393_v51 }
 0x18a   :  { %397 = vadd.xlane.f32.xlu0 %v396_v52 }
 0x19f   :  { %388 = vadd.xlane.f32.xlu1 %v387_v53 }
 0x1eb   :  { %v632_v55 = vpop.xlane.xlu0 %631 }
 0x1ec   :  { %v654_v57 = vmul.f32 2.0, %v632_v55 }
 0x1ee   :  { %v673_v62 = vrot.slane %v654_v57, %v1350_v56 }
 0x1ef   :  { %v638_v58 = vpop.xlane.xlu0 %637  ;;  %v635_v59 = vpop.xlane.xlu1 %634 }
 0x1f0   :  { %v656_v60 = vmul.f32 2.0, %v638_v58  ;;  %v655_v61 = vmul.f32 2.0, %v635_v59 }
 0x1f2   :  { %v677_v63 = vrot.slane %v655_v61, %v1350_v56  ;;  %v681_v0 = vrot.slane %v656_v60, %v1350_v56 }
 0x1f3   :  { %v641_v1 = vpop.xlane.xlu0 %640  ;;  %v644_v23 = vpop.xlane.xlu1 %643 }
 0x1f4   :  { %v702_v2 = vsel %vm447_vm3, %v677_v63, %v673_v62  ;;  %v657_v4 = vmul.f32 2.0, %v641_v1  ;;  %v658_v5 = vmul.f32 2.0, %v644_v23 }
 0x1f5   :  { %v703_v7 = vsel %vm449_vm4, %v681_v0, %v702_v2 }
 0x1f6   :  { %v685_v6 = vrot.slane %v657_v4, %v1350_v56  ;;  %v689_v8 = vrot.slane %v658_v5, %v1350_v56 }
 0x1f7   :  { %v647_v9 = vpop.xlane.xlu0 %646  ;;  %v650_v10 = vpop.xlane.xlu1 %649 }
 0x1f8   :  { %v704_v11 = vsel %vm451_vm5, %v685_v6, %v703_v7  ;;  %v659_v12 = vmul.f32 2.0, %v647_v9  ;;  %v660_v13 = vmul.f32 2.0, %v650_v10 }
 0x1f9   :  { %v705_v24 = vsel %vm453_vm6, %v689_v8, %v704_v11 }
 0x1fa   :  { %v693_v15 = vrot.slane %v659_v12, %v1350_v56  ;;  %v697_v25 = vrot.slane %v660_v13, %v1350_v56 }
 0x1fb   :  { %v653_v26 = vpop.xlane.xlu0 %652  ;;  %v274_v28 = vpop.permute.xlu1 %273 }
 0x1fc   :  { %v661_v29 = vmul.f32 2.0, %v653_v26  ;;  %v706_v30 = vsel %vm455_vm7, %v693_v15, %v705_v24  ;;  %vm275_vm10 = vcmp.lt.s32.totalorder %v1346_v54, %v274_v28 }
 0x1fd   :  { %v707_v32 = vsel %vm457_vm8, %v697_v25, %v706_v30 }
 0x1fe   :  { %v701_v31 = vrot.slane %v661_v29, %v1350_v56 }
 0x1ff   :  { %v377_v36 = vpop.xlane.xlu0 %376 }
 0x200   :  { %v708_v33 = vsel %vm459_vm9, %v701_v31, %v707_v32  ;;  %v399_v45 = vmul.f32 2.0, %v377_v36  ;;  %v487_v31 = vsub.s32 1, %v1306_v27  ;;  %v494_v36 = vsub.s32 2, %v1306_v27 }
 0x201   :  { %v710_v34 = vsel %vm275_vm10, %v708_v33, -1e+09 }
 0x202   :  { %v711_v35 = vsel %vm463_vm11, %v710_v34, -inf  ;;  %v418_v50 = vrot.slane %v399_v45, %v1350_v56  ;;  %v522_v45 = vsub.s32 6, %v1306_v27 }
 0x203   :  { %712 = vmax.xlane.f32.xlu0 %v711_v35  ;;  %v380_v37 = vpop.xlane.xlu0 %379  ;;  %v501_v35 = vsub.s32 3, %v1306_v27 }
 0x204   :  { %v400_v43 = vmul.f32 2.0, %v380_v37 }
 0x206   :  { %v422_v47 = vrot.slane %v400_v43, %v1350_v56 }
 0x207   :  { %v383_v39 = vpop.xlane.xlu0 %382 }
 0x208   :  { %v401_v44 = vmul.f32 2.0, %v383_v39  ;;  %v448_v58 = vsel %vm447_vm3, %v422_v47, %v418_v50 }
 0x20a   :  { %v426_v48 = vrot.slane %v401_v44, %v1350_v56  ;;  %v529_v44 = vsub.s32 7, %v1306_v27 }
 0x20b   :  { %v386_v40 = vpop.xlane.xlu0 %385 }
 0x20c   :  { %v402_v46 = vmul.f32 2.0, %v386_v40  ;;  %v450_v60 = vsel %vm449_vm4, %v426_v48, %v448_v58  ;;  %v515_v40 = vsub.s32 5, %v1306_v27 }
 0x20e   :  { %v430_v51 = vrot.slane %v402_v46, %v1350_v56 }
 0x20f   :  { %v392_v41 = vpop.xlane.xlu0 %391 }
 0x210   :  { %v404_v52 = vmul.f32 2.0, %v392_v41  ;;  %v452_v62 = vsel %vm451_vm5, %v430_v51, %v450_v60  ;;  %v508_v41 = vsub.s32 4, %v1306_v27 }
 0x212   :  { %v438_v63 = vrot.slane %v404_v52, %v1350_v56 }
 0x213   :  { %v395_v42 = vpop.xlane.xlu0 %394 }
 0x214   :  { %v405_v55 = vmul.f32 2.0, %v395_v42 }
 0x216   :  { %v442_v0 = vrot.slane %v405_v55, %v1350_v56 }
 0x217   :  { %v398_v49 = vpop.xlane.xlu0 %397 }
 0x218   :  { %v406_v59 = vmul.f32 2.0, %v398_v49 }
 0x21a   :  { %v446_v23 = vrot.slane %v406_v59, %v1350_v56 }
 0x22c   :  { %v389_v53 = vpop.xlane.xlu1 %388 }
 0x22d   :  { %v403_v57 = vmul.f32 2.0, %v389_v53 }
 0x22f   :  { %v434_v61 = vrot.slane %v403_v57, %v1350_v56 }
 0x231   :  { %v454_v1 = vsel %vm453_vm6, %v434_v61, %v452_v62 }
 0x232   :  { %v456_v2 = vsel %vm455_vm7, %v438_v63, %v454_v1  ;;  %v881_v63 = vld [vmem:[%s1513_s7 + $0x8] sm:$0xff] }
 0x233   :  { %v458_v4 = vsel %vm457_vm8, %v442_v0, %v456_v2  ;;  %v882_v0 = vld [vmem:[%s1513_s7 + $0x10] sm:$0xff] }
 0x234   :  { %v460_v5 = vsel %vm459_vm9, %v446_v23, %v458_v4  ;;  %v883_v23 = vld [vmem:[%s1513_s7 + $0x18] sm:$0xff]  ;;  %v884_v4 = vld [vmem:[%s1513_s7 + $0x20] sm:$0xff] }
 0x235   :  { %v462_v6 = vsel %vm275_vm10, %v460_v5, -1e+09  ;;  %v1101_v2 = vpack.c.bf16 %v883_v23, %v882_v0  ;;  %v885_v5 = vld [vmem:[%s1513_s7 + $0x28] sm:$0xff] }
 0x236   :  { %v464_v7 = vsel %vm463_vm11, %v462_v6, -inf }
 0x237   :  { %465 = vmax.xlane.f32.xlu0 %v464_v7  ;;  %v886_v7 = vld [vmem:[%s1513_s7 + $0x30] sm:$0xff] }
 0x290   :  { %v713_v8 = vpop.xlane.xlu0 %712 }
 0x291   :  { %v714_v9 = vsub.f32 %v710_v34, %v713_v8  ;;  %v887_v8 = vld [vmem:[%s1513_s7 + $0x38] sm:$0xff] }
 0x293   :  { %v715_v10 = vmul.f32 1.442695, %v714_v9  ;;  %v1107_v9 = vpack.c.bf16 %v887_v8, %v886_v7 }
 0x295   :  { %1120 = vpow2.f32 %v715_v10 }
 0x29f   :  { %v1121_v11 = vpop.eup %1120 }
 0x2a0   :  { %v717_v12 = vsel %vm463_vm11, %v1121_v11, 0.0 }
 0x2a1   :  { %718 = vadd.xlane.f32.xlu0 %v717_v12 }
 0x2c4   :  { %v466_v56 = vpop.xlane.xlu0 %465 }
 0x2c5   :  { %v467_v13 = vsub.f32 %v462_v6, %v466_v56  ;;  %v1104_v6 = vpack.c.bf16 %v885_v5, %v884_v4 }
 0x2c7   :  { %v468_v15 = vmul.f32 1.442695, %v467_v13 }
 0x2c9   :  { %1122 = vpow2.f32 %v468_v15 }
 0x2d3   :  { %v1123_v24 = vpop.eup %1122 }
 0x2d4   :  { %v470_v25 = vsel %vm463_vm11, %v1123_v24, 0.0 }
 0x2d5   :  { %471 = vadd.xlane.f32.xlu0 %v470_v25 }
 0x32e   :  { %v719_v54 = vpop.xlane.xlu0 %718 }
 0x32f   :  { %1124 = vrcp.f32 %v719_v54 }
 0x339   :  { %v1125_v26 = vpop.eup %1124 }
 0x33a   :  { %v721_v28 = vmul.f32 %v1125_v26, %v719_v54 }
 0x33c   :  { %v722_v29 = vsub.f32 2.0, %v721_v28 }
 0x33e   :  { %v723_v30 = vmul.f32 %v1125_v26, %v722_v29 }
 0x340   :  { %v724_v32 = vmul.f32 %v1121_v11, %v723_v30 }
 0x342   :  { %v735_v33 = vrot.slane %v724_v32, %v487_v31  ;;  %v728_v34 = vrot.slane %v724_v32, %v1316_v38  ;;  %v749_v37 = vrot.slane %v724_v32, %v501_v35  ;;  %v742_v39 = vrot.slane %v724_v32, %v494_v36 }
 0x343   :  { %v763_v42 = vrot.slane %v724_v32, %v515_v40  ;;  %v756_v43 = vrot.slane %v724_v32, %v508_v41  ;;  %v777_v46 = vrot.slane %v724_v32, %v529_v44  ;;  %v770_v47 = vrot.slane %v724_v32, %v522_v45 }
 0x344   :  { %737 = vbcast.lane.b32.xlu1 %v735_v33, 256  ;;  %730 = vbcast.lane.b32.xlu0 %v728_v34, 256 }
 0x348   :  { %751 = vbcast.lane.b32.xlu1 %v749_v37, 256  ;;  %744 = vbcast.lane.b32.xlu0 %v742_v39, 256 }
 0x34c   :  { %765 = vbcast.lane.b32.xlu1 %v763_v42, 256  ;;  %758 = vbcast.lane.b32.xlu0 %v756_v43, 256 }
 0x350   :  { %779 = vbcast.lane.b32.xlu1 %v777_v46, 256  ;;  %772 = vbcast.lane.b32.xlu0 %v770_v47, 256 }
 0x362   :  { %v472_v48 = vpop.xlane.xlu0 %471 }
 0x363   :  { %1126 = vrcp.f32 %v472_v48 }
 0x36d   :  { %v1127_v49 = vpop.eup %1126 }
 0x36e   :  { %v474_v50 = vmul.f32 %v1127_v49, %v472_v48 }
 0x370   :  { %v475_v51 = vsub.f32 2.0, %v474_v50 }
 0x372   :  { %v476_v52 = vmul.f32 %v1127_v49, %v475_v51 }
 0x374   :  { %v1399_v53 = vmul.f32 %v1123_v24, %v476_v52 }
 0x376   :  { %v488_v55 = vrot.slane %v1399_v53, %v487_v31  ;;  %v481_v57 = vrot.slane %v1399_v53, %v1316_v38  ;;  %v502_v27 = vrot.slane %v1399_v53, %v501_v35  ;;  %v495_v58 = vrot.slane %v1399_v53, %v494_v36  ;;  %v880_v38 = vld [vmem:[%s1513_s7] sm:$0xff]  ;;  %s1159_s7 = smov 32  }
 0x377   :  { %v516_v59 = vrot.slane %v1399_v53, %v515_v40  ;;  %v509_v60 = vrot.slane %v1399_v53, %v508_v41  ;;  %v530_v61 = vrot.slane %v1399_v53, %v529_v44  ;;  %v523_v62 = vrot.slane %v1399_v53, %v522_v45 }
 0x378   :  { %490 = vbcast.lane.b32.xlu1 %v488_v55, 256  ;;  %483 = vbcast.lane.b32.xlu0 %v481_v57, 256  ;;  %v1098_v1 = vpack.c.bf16 %v881_v63, %v880_v38 }
 0x37a   :  { %1099 = vmatpush3.bf16.msra.mxu0 %v1098_v1 }
 0x37b   :  { %1100 = vmatprep.subr.bf16.mxu0 %v1152_v3 }
 0x37c   :  { %504 = vbcast.lane.b32.xlu1 %v502_v27, 256  ;;  %497 = vbcast.lane.b32.xlu0 %v495_v58, 256 }
 0x37e   :  { %1102 = vmatpush3.bf16.msra.mxu0 %v1101_v2 }
 0x37f   :  { %1103 = vmatprep.subr.bf16.mxu0 %v1152_v3 }
 0x380   :  { %518 = vbcast.lane.b32.xlu1 %v516_v59, 256  ;;  %511 = vbcast.lane.b32.xlu0 %v509_v60, 256 }
 0x382   :  { %1105 = vmatpush3.bf16.msra.mxu0 %v1104_v6 }
 0x383   :  { %1106 = vmatprep.subr.bf16.mxu0 %v1152_v3 }
 0x384   :  { %532 = vbcast.lane.b32.xlu1 %v530_v61, 256  ;;  %525 = vbcast.lane.b32.xlu0 %v523_v62, 256 }
 0x386   :  { %1108 = vmatpush3.bf16.msra.mxu0 %v1107_v9 }
 0x388   :  { %971 = vrot.lane.b32.xlu1 %v724_v32, %s1158_s13 }
 0x3b6   :  { %v738_v10 = vpop.permute.xlu1 %737  ;;  %v731_v11 = vpop.permute.xlu0 %730 }
 0x3b7   :  { %v782_v12 = vmul.f32 %v738_v10, %v1257_v16  ;;  %v781_v56 = vmul.f32 %v731_v11, %v1245_v14 }
 0x3b9   :  { %v796_v13 = vsel %vm55_vm1, %v782_v12, 0.0  ;;  %v789_v15 = vsel %vm55_vm1, %v781_v56, 0.0 }
 0x3ba   :  { %v797_v24 = vrot.slane %v796_v13, 4  ;;  %v790_v25 = vrot.slane %v789_v15, 4  ;;  %v752_v54 = vpop.permute.xlu1 %751  ;;  %v745_v26 = vpop.permute.xlu0 %744 }
 0x3bb   :  { %v784_v28 = vmul.f32 %v752_v54, %v1273_v18  ;;  %v783_v29 = vmul.f32 %v745_v26, %v1263_v17 }
 0x3bc   :  { %v798_v3 = vadd.f32 %v797_v24, %v796_v13  ;;  %v791_v30 = vadd.f32 %v790_v25, %v789_v15 }
 0x3bd   :  { %v810_v31 = vsel %vm55_vm1, %v784_v28, 0.0  ;;  %v803_v32 = vsel %vm55_vm1, %v783_v29, 0.0 }
 0x3be   :  { %v799_v33 = vrot.slane %v798_v3, 2  ;;  %v792_v34 = vrot.slane %v791_v30, 2  ;;  %v811_v35 = vrot.slane %v810_v31, 4  ;;  %v804_v36 = vrot.slane %v803_v32, 4  ;;  %v766_v37 = vpop.permute.xlu1 %765  ;;  %v759_v39 = vpop.permute.xlu0 %758 }
 0x3bf   :  { %v786_v40 = vmul.f32 %v766_v37, %v1287_v20  ;;  %v785_v41 = vmul.f32 %v759_v39, %v1278_v19 }
 0x3c0   :  { %v800_v42 = vadd.f32 %v799_v33, %v798_v3  ;;  %v793_v43 = vadd.f32 %v792_v34, %v791_v30  ;;  %v812_v44 = vadd.f32 %v811_v35, %v810_v31  ;;  %v805_v45 = vadd.f32 %v804_v36, %v803_v32 }
 0x3c1   :  { %v824_v46 = vsel %vm55_vm1, %v786_v40, 0.0  ;;  %v817_v47 = vsel %vm55_vm1, %v785_v41, 0.0 }
 0x3c2   :  { %v801_v48 = vrot.slane %v800_v42, 1  ;;  %v794_v49 = vrot.slane %v793_v43, 1  ;;  %v813_v50 = vrot.slane %v812_v44, 2  ;;  %v806_v51 = vrot.slane %v805_v45, 2  ;;  %v780_v52 = vpop.permute.xlu1 %779  ;;  %v773_v55 = vpop.permute.xlu0 %772 }
 0x3c3   :  { %v825_v57 = vrot.slane %v824_v46, 4  ;;  %v818_v27 = vrot.slane %v817_v47, 4  ;;  %v788_v58 = vmul.f32 %v780_v52, %v1301_v22  ;;  %v787_v59 = vmul.f32 %v773_v55, %v1292_v21 }
 0x3c4   :  { %v802_v60 = vadd.f32 %v801_v48, %v800_v42  ;;  %v814_v61 = vadd.f32 %v813_v50, %v812_v44  ;;  %v807_v62 = vadd.f32 %v806_v51, %v805_v45  ;;  %v795_v23 = vadd.f32 %v794_v49, %v793_v43 }
 0x3c5   :  { %v826_v38 = vadd.f32 %v825_v57, %v824_v46  ;;  %v819_v63 = vadd.f32 %v818_v27, %v817_v47  ;;  %v838_v0 = vsel %vm55_vm1, %v788_v58, 0.0  ;;  %v831_v1 = vsel %vm55_vm1, %v787_v59, 0.0 }
 0x3c6   :  { %v815_v2 = vrot.slane %v814_v61, 1  ;;  %v808_v4 = vrot.slane %v807_v62, 1  ;;  %v839_v5 = vrot.slane %v838_v0, 4  ;;  %v832_v8 = vrot.slane %v831_v1, 4 }
 0x3c7   :  { %v827_v6 = vrot.slane %v826_v38, 2  ;;  %v820_v7 = vrot.slane %v819_v63, 2  ;;  %v869_v13 = vsel %vm447_vm3, %v802_v60, %v795_v23 }
 0x3c8   :  { %v809_v9 = vadd.f32 %v808_v4, %v807_v62  ;;  %v840_v10 = vadd.f32 %v839_v5, %v838_v0  ;;  %v833_v56 = vadd.f32 %v832_v8, %v831_v1  ;;  %v816_v15 = vadd.f32 %v815_v2, %v814_v61 }
 0x3c9   :  { %v828_v11 = vadd.f32 %v827_v6, %v826_v38  ;;  %v821_v12 = vadd.f32 %v820_v7, %v819_v63 }
 0x3ca   :  { %v841_v24 = vrot.slane %v840_v10, 2  ;;  %v870_v25 = vsel %vm449_vm4, %v809_v9, %v869_v13  ;;  %v834_v28 = vrot.slane %v833_v56, 2 }
 0x3cb   :  { %v829_v54 = vrot.slane %v828_v11, 1  ;;  %v822_v26 = vrot.slane %v821_v12, 1  ;;  %v871_v33 = vsel %vm451_vm5, %v816_v15, %v870_v25 }
 0x3cc   :  { %v842_v29 = vadd.f32 %v841_v24, %v840_v10  ;;  %v835_v30 = vadd.f32 %v834_v28, %v833_v56 }
 0x3cd   :  { %v823_v3 = vadd.f32 %v822_v26, %v821_v12  ;;  %v830_v31 = vadd.f32 %v829_v54, %v828_v11 }
 0x3ce   :  { %v843_v32 = vrot.slane %v842_v29, 1  ;;  %v836_v34 = vrot.slane %v835_v30, 1 }
 0x3cf   :  { %v872_v35 = vsel %vm453_vm6, %v823_v3, %v871_v33 }
 0x3d0   :  { %v844_v36 = vadd.f32 %v843_v32, %v842_v29  ;;  %v837_v37 = vadd.f32 %v836_v34, %v835_v30  ;;  %v873_v39 = vsel %vm455_vm7, %v830_v31, %v872_v35 }
 0x3d2   :  { %v874_v40 = vsel %vm457_vm8, %v837_v37, %v873_v39 }
 0x3d3   :  { %v875_v41 = vsel %vm459_vm9, %v844_v36, %v874_v40 }
 0x3d4   :  { %876 = vrot.lane.b32.xlu0 %v875_v41, %s1159_s7 }
 0x3ea   :  { %v491_v42 = vpop.permute.xlu1 %490  ;;  %v484_v43 = vpop.permute.xlu0 %483 }
 0x3eb   :  { %v535_v44 = vmul.f32 %v491_v42, %v1257_v16  ;;  %v534_v45 = vmul.f32 %v484_v43, %v1245_v14 }
 0x3ed   :  { %v549_v46 = vsel %vm55_vm1, %v535_v44, 0.0  ;;  %v542_v47 = vsel %vm55_vm1, %v534_v45, 0.0 }
 0x3ee   :  { %v550_v48 = vrot.slane %v549_v46, 4  ;;  %v543_v49 = vrot.slane %v542_v47, 4  ;;  %v505_v50 = vpop.permute.xlu1 %504  ;;  %v498_v51 = vpop.permute.xlu0 %497 }
 0x3ef   :  { %v537_v52 = vmul.f32 %v505_v50, %v1273_v18  ;;  %v536_v55 = vmul.f32 %v498_v51, %v1263_v17 }
 0x3f0   :  { %v551_v57 = vadd.f32 %v550_v48, %v549_v46  ;;  %v544_v27 = vadd.f32 %v543_v49, %v542_v47 }
 0x3f1   :  { %v563_v58 = vsel %vm55_vm1, %v537_v52, 0.0  ;;  %v556_v16 = vsel %vm55_vm1, %v536_v55, 0.0 }
 0x3f2   :  { %v552_v59 = vrot.slane %v551_v57, 2  ;;  %v545_v14 = vrot.slane %v544_v27, 2  ;;  %v564_v60 = vrot.slane %v563_v58, 4  ;;  %v557_v61 = vrot.slane %v556_v16, 4  ;;  %v519_v62 = vpop.permute.xlu1 %518  ;;  %v512_v38 = vpop.permute.xlu0 %511 }
 0x3f3   :  { %v539_v63 = vmul.f32 %v519_v62, %v1287_v20  ;;  %v538_v0 = vmul.f32 %v512_v38, %v1278_v19 }
 0x3f4   :  { %v553_v1 = vadd.f32 %v552_v59, %v551_v57  ;;  %v546_v18 = vadd.f32 %v545_v14, %v544_v27  ;;  %v565_v23 = vadd.f32 %v564_v60, %v563_v58  ;;  %v558_v17 = vadd.f32 %v557_v61, %v556_v16  ;;  %v1005_v61 = vld [vmem:[%s1514_s8] ss:$0 sm:$0xff] }
 0x3f5   :  { %v577_v2 = vsel %vm55_vm1, %v539_v63, 0.0  ;;  %v570_v4 = vsel %vm55_vm1, %v538_v0, 0.0 }
 0x3f6   :  { %v554_v5 = vrot.slane %v553_v1, 1  ;;  %v547_v6 = vrot.slane %v546_v18, 1  ;;  %v566_v7 = vrot.slane %v565_v23, 2  ;;  %v559_v8 = vrot.slane %v558_v17, 2  ;;  %v533_v9 = vpop.permute.xlu1 %532  ;;  %v526_v10 = vpop.permute.xlu0 %525 }
 0x3f7   :  { %v578_v11 = vrot.slane %v577_v2, 4  ;;  %v571_v12 = vrot.slane %v570_v4, 4  ;;  %v541_v20 = vmul.f32 %v533_v9, %v1301_v22  ;;  %v540_v19 = vmul.f32 %v526_v10, %v1292_v21 }
 0x3f8   :  { %v555_v56 = vadd.f32 %v554_v5, %v553_v1  ;;  %v548_v13 = vadd.f32 %v547_v6, %v546_v18  ;;  %v567_v15 = vadd.f32 %v566_v7, %v565_v23  ;;  %v560_v24 = vadd.f32 %v559_v8, %v558_v17 }
 0x3f9   :  { %v579_v25 = vadd.f32 %v578_v11, %v577_v2  ;;  %v572_v54 = vadd.f32 %v571_v12, %v570_v4  ;;  %v591_v26 = vsel %vm55_vm1, %v541_v20, 0.0  ;;  %v584_v28 = vsel %vm55_vm1, %v540_v19, 0.0 }
 0x3fa   :  { %v568_v29 = vrot.slane %v567_v15, 1  ;;  %v561_v3 = vrot.slane %v560_v24, 1  ;;  %v592_v30 = vrot.slane %v591_v26, 4  ;;  %v972_v31 = vpop.permute.xlu1 %971  ;;  %v585_v34 = vrot.slane %v584_v28, 4 }
 0x3fb   :  { %v580_v32 = vrot.slane %v579_v25, 2  ;;  %v573_v33 = vrot.slane %v572_v54, 2  ;;  %v974_v21 = vsel %vm463_vm11, %v1399_v53, %v972_v31  ;;  %v853_v37 = vsel %vm447_vm3, %v555_v56, %v548_v13 }
 0x3fc   :  { %v569_v22 = vadd.f32 %v568_v29, %v567_v15  ;;  %v562_v35 = vadd.f32 %v561_v3, %v560_v24  ;;  %v593_v36 = vadd.f32 %v592_v30, %v591_v26  ;;  %975 = vst.msk [vmem:[%s1516_s10] sm:$0xff] %vm374_vm2, %v974_v21  ;;  %v586_v41 = vadd.f32 %v585_v34, %v584_v28 }
 0x3fd   :  { %v581_v39 = vadd.f32 %v580_v32, %v579_v25  ;;  %v574_v40 = vadd.f32 %v573_v33, %v572_v54 }
 0x3fe   :  { %v854_v42 = vsel %vm449_vm4, %v562_v35, %v853_v37  ;;  %v594_v43 = vrot.slane %v593_v36, 2  ;;  %v587_v46 = vrot.slane %v586_v41, 2 }
 0x3ff   :  { %v582_v44 = vrot.slane %v581_v39, 1  ;;  %v575_v45 = vrot.slane %v574_v40, 1  ;;  %v855_v53 = vsel %vm451_vm5, %v569_v22, %v854_v42 }
 0x400   :  { %v595_v47 = vadd.f32 %v594_v43, %v593_v36  ;;  %v588_v50 = vadd.f32 %v587_v46, %v586_v41 }
 0x401   :  { %v583_v48 = vadd.f32 %v582_v44, %v581_v39  ;;  %v576_v49 = vadd.f32 %v575_v45, %v574_v40 }
 0x402   :  { %v596_v51 = vrot.slane %v595_v47, 1  ;;  %v589_v52 = vrot.slane %v588_v50, 1 }
 0x403   :  { %v856_v55 = vsel %vm453_vm6, %v576_v49, %v855_v53 }
 0x404   :  { %v597_v57 = vadd.f32 %v596_v51, %v595_v47  ;;  %v857_v27 = vsel %vm455_vm7, %v583_v48, %v856_v55  ;;  %v590_v58 = vadd.f32 %v589_v52, %v588_v50 }
 0x406   :  { %v858_v16 = vsel %vm457_vm8, %v590_v58, %v857_v27 }
 0x407   :  { %v859_v59 = vsel %vm459_vm9, %v597_v57, %v858_v16 }
 0x446   :  { %v877_v14 = vpop.permute.xlu0 %876 }
 0x447   :  { %v879_v60 = vsel %vm55_vm1, %v859_v59, %v877_v14 }
 0x448   :  { %1081 = vmatmul.mubr.msk.f32.vlgmr.msra.gmra.mrb[2].mxu0 %vm895_vm12, %v879_v60 }
 0x51b   :  { %v965_v62 = vpop.f32.mrb[2].mxu0 }
 0x51c   :  { %v966_v38 = vadd.f32 %v1005_v61, %v965_v62  ;;  %v1082_v63 = vpop.f32.mrb[3].mxu0 }
 0x51e   :  { %969 = vst.msk [vmem:[#allocation2] sm:$0xff] %vm55_vm1, %v966_v38 }
 0x51f   :  { %1139 = shalt.err (!%p1136_p4)
}
 0x520   :  { %s1140_s6 = scalar_lea.hbm %s1515_s9, 128 }
 0x521   :  { %p1141_p5 = scmp.ne.s32.totalorder %s1515_s9, %s1140_s6  ;;  %p1144_p6 = scmp.lt.u32.totalorder %s1140_s6, %s1515_s9 }
 0x523   :  { %p1146_p7 = pnand %p1144_p6, %p1141_p5 }
 0x525   :  { %1149 = shalt.err (!%p1146_p7)
}
 0x526   :  { %985 = dma.vmem_to_hbm [thread:$0]  %s983_s25, 128, %s1515_s9, [#allocation3]  }
 0x527   :  { %1150 = dma.done.wait [#allocation3], 128  }
 0x528   :  { %1151 = vsyncadd [#allocation3], 4294967168 }
 0x529   :  { %993 = vsyncpa [#allocation3], 1 }

</bundles_post_ra>
